<compile_context>
chip_gen: v7x
topology: tpu7x:2x2x1
jax: 0.10.0
libtpu: 0.0.40
codegen_flags: <defaults>
</compile_context>

<pallas_src>
import functools

import jax
import jax.numpy as jnp
from jax import lax
from jax.experimental import pallas as pl
from jax.experimental.pallas import tpu as pltpu

LANES = 128
SUBLANES = 8
CHUNK_ROWS = 512        # inner fori_loop chunk (multiple of 8)
MAX_TILE_ROWS = 8192    # rows per grid block: 8192x128 f32 = 4 MiB / buffer
VMEM_LIMIT_BYTES = 40 * 1024 * 1024  # fits v7x (64 MiB phys) with headroom


def _dice_partial_kernel(x_ref, t_ref, o_ref, *, rows, block_rows, chunk_rows,
                         n_inner, all_valid):
    """Accumulates per-lane partial sums of x*t, x*x, t*t into o_ref.

    o_ref is the (1, 3, 8, 128) output block for this outer slice; its block
    index only depends on the outer ("parallel") grid axis, so it stays
    resident in VMEM across the inner ("arbitrary") reduction axis and acts as
    the carried accumulator.
    """
    o = pl.program_id(0)
    i = pl.program_id(1)
    g = o * n_inner + i            # unclamped global row-block index

    @pl.when(i == 0)
    def _():
        o_ref[...] = jnp.zeros_like(o_ref)

    n_chunks = block_rows // chunk_rows  # exact by construction

    def accumulate(masked):
        def body(c, carry):
            acc_xt, acc_xx, acc_tt = carry
            start = c * chunk_rows
            x = x_ref[pl.ds(pl.multiple_of(start, chunk_rows), chunk_rows), :]
            t = t_ref[pl.ds(pl.multiple_of(start, chunk_rows), chunk_rows), :]
            x = x.astype(jnp.float32)
            t = t.astype(jnp.float32)
            if masked:
                # Rows beyond the logical array extent hold unspecified data
                # (partial / out-of-range blocks); zero them out.
                local = lax.broadcasted_iota(jnp.int32, (chunk_rows, 1), 0)
                valid = (g * block_rows + start + local) < rows
                x = jnp.where(valid, x, 0.0)
                t = jnp.where(valid, t, 0.0)
            sub = chunk_rows // SUBLANES
            xt = jnp.sum((x * t).reshape(sub, SUBLANES, LANES), axis=0)
            xx = jnp.sum((x * x).reshape(sub, SUBLANES, LANES), axis=0)
            tt = jnp.sum((t * t).reshape(sub, SUBLANES, LANES), axis=0)
            return acc_xt + xt, acc_xx + xx, acc_tt + tt

        init = (o_ref[0, 0], o_ref[0, 1], o_ref[0, 2])
        acc_xt, acc_xx, acc_tt = lax.fori_loop(0, n_chunks, body, init)
        o_ref[0, 0] = acc_xt
        o_ref[0, 1] = acc_xx
        o_ref[0, 2] = acc_tt

    if all_valid:
        # Every block in the grid is fully in-bounds: no masking anywhere.
        accumulate(masked=False)
    else:
        fully_valid = (g + 1) * block_rows <= rows

        @pl.when(fully_valid)
        def _():
            accumulate(masked=False)

        @pl.when(jnp.logical_not(fully_valid))
        def _():
            accumulate(masked=True)


def _sums_jax(a, b):
    a = a.astype(jnp.float32)
    b = b.astype(jnp.float32)
    return jnp.stack([jnp.sum(a * b), jnp.sum(a * a), jnp.sum(b * b)])


def dice_loss(x, target):
    """Equivalent of DiceLoss().forward(input, target).

    `target` may be passed in a narrow dtype (bool / int8 / bf16); the kernel
    casts to f32 internally, so narrow targets move proportionally fewer HBM
    bytes.
    """
    smooth = 1e-05
    xf = jnp.ravel(x)          # original dtypes stay in HBM; cast in-kernel
    tf = jnp.ravel(target)
    n = xf.shape[0]

    align = SUBLANES * LANES   # 1024: keeps every row count a multiple of 8
    n_main = (n // align) * align

    if n_main == 0:
        # Tiny input: no kernel launch worth it.
        sums = _sums_jax(xf, tf)
    else:
        rows = n_main // LANES
        x2d = xf[:n_main].reshape(rows, LANES)
        t2d = tf[:n_main].reshape(rows, LANES)

        # --- tiling -------------------------------------------------------
        if rows <= CHUNK_ROWS:
            block_rows = rows          # single block == full array extent
            chunk_rows = rows
        else:
            block_rows = min(MAX_TILE_ROWS, (rows // CHUNK_ROWS) * CHUNK_ROWS)
            chunk_rows = CHUNK_ROWS
        blocks_total = pl.cdiv(rows, block_rows)

        # Outer parallel axis: 2 slices so both v7x TensorCores stream
        # (harmless / sequential on v5e & v6e).
        n_outer = 2 if blocks_total >= 8 else 1
        n_inner = pl.cdiv(blocks_total, n_outer)
        all_valid = (n_outer * n_inner * block_rows) == rows

        kernel = functools.partial(
            _dice_partial_kernel,
            rows=rows, block_rows=block_rows, chunk_rows=chunk_rows,
            n_inner=n_inner, all_valid=all_valid,
        )

        def in_map(o, i):
            # Clamp so grid points past the last real block re-point at it
            # (their contribution is masked to zero in the kernel; the DMA is
            # usually elided because the block index repeats).
            return (jnp.minimum(o * n_inner + i, blocks_total - 1), 0)

        bytes_accessed = (x2d.size * x2d.dtype.itemsize
                          + t2d.size * t2d.dtype.itemsize
                          + n_outer * 3 * SUBLANES * LANES * 4)

        partials = pl.pallas_call(
            kernel,
            out_shape=jax.ShapeDtypeStruct((n_outer, 3, SUBLANES, LANES),
                                           jnp.float32),
            grid_spec=pltpu.PrefetchScalarGridSpec(
                num_scalar_prefetch=0,
                grid=(n_outer, n_inner),
                in_specs=[
                    pl.BlockSpec((block_rows, LANES), in_map),
                    pl.BlockSpec((block_rows, LANES), in_map),
                ],
                out_specs=pl.BlockSpec((1, 3, SUBLANES, LANES),
                                       lambda o, i: (o, 0, 0, 0)),
            ),
            compiler_params=pltpu.CompilerParams(
                dimension_semantics=("parallel", "arbitrary"),
                vmem_limit_bytes=VMEM_LIMIT_BYTES,
            ),
            cost_estimate=pl.CostEstimate(
                flops=6 * n_main,
                transcendentals=0,
                bytes_accessed=bytes_accessed,
            ),
        )(x2d, t2d)

        sums = jnp.sum(partials, axis=(0, 2, 3))
        if n_main < n:
            # <1024-element tail handled in plain JAX: no pad / no full copy.
            sums = sums + _sums_jax(xf[n_main:], tf[n_main:])

    inter, a_sum, b_sum = sums[0], sums[1], sums[2]
    return 1.0 - (2.0 * inter + smooth) / (a_sum + b_sum + smooth)


def _dice_loss_ref(x, target):
    smooth = 1e-05
    xf = jnp.ravel(x).astype(jnp.float32)
    tf = jnp.ravel(target).astype(jnp.float32)
    inter = jnp.sum(xf * tf)
    a_sum = jnp.sum(xf * xf)
    b_sum = jnp.sum(tf * tf)
    return 1.0 - (2.0 * inter + smooth) / (a_sum + b_sum + smooth)


if __name__ == "__main__":
    key = jax.random.PRNGKey(0)
    k1, k2 = jax.random.split(key)
    # NCHW: batch=2, channels=4, spatial=16x16 (sigmoid probs vs. binary mask)
    x = jax.nn.sigmoid(jax.random.normal(k1, (2, 4, 16, 16), dtype=jnp.float32))
    target = (jax.random.uniform(k2, (2, 4, 16, 16)) > 0.5).astype(jnp.float32)

    loss = jax.block_until_ready(dice_loss(x, target))
    ref = jax.block_until_ready(_dice_loss_ref(x, target))

    assert jnp.allclose(loss, ref, atol=1e-6, rtol=1e-6), (loss, ref)
    print("KERNEL_OK")
</pallas_src>

<mosaic_0001>
module attributes {stable_mosaic.version = 11 : i64} {
  func.func @_dice_partial_kernel(%arg0: i32, %arg1: i32, %arg2: memref<16x128xf32, #tpu.memory_space<vmem>>, %arg3: memref<16x128xf32, #tpu.memory_space<vmem>>, %arg4: memref<1x3x8x128xf32, #tpu.memory_space<vmem>>) attributes {dimension_semantics = [#tpu.dimension_semantics<parallel>, #tpu.dimension_semantics<arbitrary>], iteration_bounds = array<i64: 1, 1>, scalar_prefetch = 0 : i64, scratch_operands = 0 : i64, tpu.core_type = #tpu.core_type<tc>, window_params = [{transform_indices = @transform_0, window_bounds = array<i64: 16, 128>}, {transform_indices = @transform_1, window_bounds = array<i64: 16, 128>}, {transform_indices = @transform_2, window_bounds = array<i64: 1, 3, 8, 128>}]} {
    %c0_i32 = arith.constant 0 : i32
    %0 = arith.cmpi eq, %arg1, %c0_i32 : i32
    %1 = arith.extui %0 : i1 to i32
    %c0_i32_0 = arith.constant 0 : i32
    %2 = arith.cmpi ne, %1, %c0_i32_0 : i32
    scf.if %2 {
      %cst_27 = arith.constant 0.000000e+00 : f32
      %37 = vector.broadcast %cst_27 : f32 to vector<1x3x8x128xf32>
      %c0_28 = arith.constant 0 : index
      %c0_29 = arith.constant 0 : index
      %c0_30 = arith.constant 0 : index
      %c0_31 = arith.constant 0 : index
      %38 = vector.load %arg4[%c0_28, %c0_29, %c0_30, %c0_31] : memref<1x3x8x128xf32, #tpu.memory_space<vmem>>, vector<1x3x8x128xf32>
      tpu.vector_store %arg4[%c0_28, %c0_29, %c0_30, %c0_31], %37 {strides = array<i32>} : memref<1x3x8x128xf32, #tpu.memory_space<vmem>>, vector<1x3x8x128xf32>,
    } else {
    }
    %c0 = arith.constant 0 : index
    %c0_1 = arith.constant 0 : index
    %c0_2 = arith.constant 0 : index
    %c0_3 = arith.constant 0 : index
    %3 = vector.load %arg4[%c0, %c0_1, %c0_2, %c0_3] : memref<1x3x8x128xf32, #tpu.memory_space<vmem>>, vector<1x1x8x128xf32>
    %4 = vector.shape_cast %3 : vector<1x1x8x128xf32> to vector<8x128xf32>
    %c0_4 = arith.constant 0 : index
    %c1 = arith.constant 1 : index
    %c0_5 = arith.constant 0 : index
    %c0_6 = arith.constant 0 : index
    %5 = vector.load %arg4[%c0_4, %c1, %c0_5, %c0_6] : memref<1x3x8x128xf32, #tpu.memory_space<vmem>>, vector<1x1x8x128xf32>
    %6 = vector.shape_cast %5 : vector<1x1x8x128xf32> to vector<8x128xf32>
    %c0_7 = arith.constant 0 : index
    %c2 = arith.constant 2 : index
    %c0_8 = arith.constant 0 : index
    %c0_9 = arith.constant 0 : index
    %7 = vector.load %arg4[%c0_7, %c2, %c0_8, %c0_9] : memref<1x3x8x128xf32, #tpu.memory_space<vmem>>, vector<1x1x8x128xf32>
    %8 = vector.shape_cast %7 : vector<1x1x8x128xf32> to vector<8x128xf32>
    %c0_i32_10 = arith.constant 0 : i32
    %c16_i32 = arith.constant 16 : i32
    %9 = arith.muli %c0_i32_10, %c16_i32 : i32
    %10 = tpu.assume_multiple %9, 16 : i32
    %11 = arith.index_cast %10 : i32 to index
    %c0_11 = arith.constant 0 : index
    %12 = vector.load %arg2[%11, %c0_11] : memref<16x128xf32, #tpu.memory_space<vmem>>, vector<16x128xf32>
    %13 = tpu.assume_multiple %9, 16 : i32
    %14 = arith.index_cast %13 : i32 to index
    %c0_12 = arith.constant 0 : index
    %15 = vector.load %arg3[%14, %c0_12] : memref<16x128xf32, #tpu.memory_space<vmem>>, vector<16x128xf32>
    %16 = arith.mulf %12, %15 : vector<16x128xf32>
    %17 = vector.shape_cast %16 : vector<16x128xf32> to vector<2x8x128xf32>
    %cst = arith.constant dense<0.000000e+00> : vector<8x128xf32>
    %18 = vector.multi_reduction <add>, %17, %cst [0] : vector<2x8x128xf32> to vector<8x128xf32>
    %19 = arith.mulf %12, %12 : vector<16x128xf32>
    %20 = vector.shape_cast %19 : vector<16x128xf32> to vector<2x8x128xf32>
    %cst_13 = arith.constant dense<0.000000e+00> : vector<8x128xf32>
    %21 = vector.multi_reduction <add>, %20, %cst_13 [0] : vector<2x8x128xf32> to vector<8x128xf32>
    %22 = arith.mulf %15, %15 : vector<16x128xf32>
    %23 = vector.shape_cast %22 : vector<16x128xf32> to vector<2x8x128xf32>
    %cst_14 = arith.constant dense<0.000000e+00> : vector<8x128xf32>
    %24 = vector.multi_reduction <add>, %23, %cst_14 [0] : vector<2x8x128xf32> to vector<8x128xf32>
    %25 = arith.addf %4, %18 : vector<8x128xf32>
    %26 = arith.addf %6, %21 : vector<8x128xf32>
    %27 = arith.addf %8, %24 : vector<8x128xf32>
    %c1_i32 = arith.constant 1 : i32
    %c0_15 = arith.constant 0 : index
    %c0_16 = arith.constant 0 : index
    %c0_17 = arith.constant 0 : index
    %c0_18 = arith.constant 0 : index
    %28 = vector.load %arg4[%c0_15, %c0_16, %c0_17, %c0_18] : memref<1x3x8x128xf32, #tpu.memory_space<vmem>>, vector<1x1x8x128xf32>
    %29 = vector.shape_cast %28 : vector<1x1x8x128xf32> to vector<8x128xf32>
    %30 = vector.shape_cast %25 : vector<8x128xf32> to vector<1x1x8x128xf32>
    tpu.vector_store %arg4[%c0_15, %c0_16, %c0_17, %c0_18], %30 {strides = array<i32>} : memref<1x3x8x128xf32, #tpu.memory_space<vmem>>, vector<1x1x8x128xf32>,
    %c0_19 = arith.constant 0 : index
    %c1_20 = arith.constant 1 : index
    %c0_21 = arith.constant 0 : index
    %c0_22 = arith.constant 0 : index
    %31 = vector.load %arg4[%c0_19, %c1_20, %c0_21, %c0_22] : memref<1x3x8x128xf32, #tpu.memory_space<vmem>>, vector<1x1x8x128xf32>
    %32 = vector.shape_cast %31 : vector<1x1x8x128xf32> to vector<8x128xf32>
    %33 = vector.shape_cast %26 : vector<8x128xf32> to vector<1x1x8x128xf32>
    tpu.vector_store %arg4[%c0_19, %c1_20, %c0_21, %c0_22], %33 {strides = array<i32>} : memref<1x3x8x128xf32, #tpu.memory_space<vmem>>, vector<1x1x8x128xf32>,
    %c0_23 = arith.constant 0 : index
    %c2_24 = arith.constant 2 : index
    %c0_25 = arith.constant 0 : index
    %c0_26 = arith.constant 0 : index
    %34 = vector.load %arg4[%c0_23, %c2_24, %c0_25, %c0_26] : memref<1x3x8x128xf32, #tpu.memory_space<vmem>>, vector<1x1x8x128xf32>
    %35 = vector.shape_cast %34 : vector<1x1x8x128xf32> to vector<8x128xf32>
    %36 = vector.shape_cast %27 : vector<8x128xf32> to vector<1x1x8x128xf32>
    tpu.vector_store %arg4[%c0_23, %c2_24, %c0_25, %c0_26], %36 {strides = array<i32>} : memref<1x3x8x128xf32, #tpu.memory_space<vmem>>, vector<1x1x8x128xf32>,
    return
  }
  func.func @transform_0(%arg0: i32, %arg1: i32) -> (i32, i32) {
    %c1_i32 = arith.constant 1 : i32
    %0 = arith.muli %arg0, %c1_i32 : i32
    %1 = arith.addi %0, %arg1 : i32
    %c0_i32 = arith.constant 0 : i32
    %2 = arith.minsi %1, %c0_i32 : i32
    %c0_i32_0 = arith.constant 0 : i32
    %c0_i32_1 = arith.constant 0 : i32
    return %2, %c0_i32_0 : i32, i32
  }
  func.func @transform_1(%arg0: i32, %arg1: i32) -> (i32, i32) {
    %c1_i32 = arith.constant 1 : i32
    %0 = arith.muli %arg0, %c1_i32 : i32
    %1 = arith.addi %0, %arg1 : i32
    %c0_i32 = arith.constant 0 : i32
    %2 = arith.minsi %1, %c0_i32 : i32
    %c0_i32_0 = arith.constant 0 : i32
    %c0_i32_1 = arith.constant 0 : i32
    return %2, %c0_i32_0 : i32, i32
  }
  func.func @transform_2(%arg0: i32, %arg1: i32) -> (i32, i32, i32, i32) {
    %c0_i32 = arith.constant 0 : i32
    %c0_i32_0 = arith.constant 0 : i32
    %c0_i32_1 = arith.constant 0 : i32
    %c0_i32_2 = arith.constant 0 : i32
    return %arg0, %c0_i32, %c0_i32_0, %c0_i32_1 : i32, i32, i32, i32
  }
}

</mosaic_0001>

<bundles_post_ra>
// kernel: tpu_custom_call.1
= control target key start
LH: loop header
LB: loop body
LE: loop exit
PB: predicated region body
PF: predicated region fallthrough
CT: control target
= control target key end

     0   :  { %7 = vsyncpa [#allocation3], 0  ;;  %s256_s0 = inlined_call_operand.hbm [shape: f32[16,128], index: 0, kind: input, shape index: {}]   ;;  %s257_s1 = inlined_call_operand.hbm [shape: f32[16,128], index: 1, kind: input, shape index: {}]   ;;  %s258_s2 = inlined_call_operand.hbm [shape: f32[1,3,8,128], index: 2, kind: output, shape index: {}]  }
   0x1   :  { %8 = vsyncpa [#allocation6], 0 }
   0x2   :  { %9 = vsyncpa [#allocation4], 0  ;;  %s191_s9 = smov [#allocation2]   ;;  %s119_s13 = scalar_lea.hbm %s256_s0, 256 }
   0x3   :  { %s21_s10 = sshll.u32 %s191_s9, 4  ;;  %p120_p0 = scmp.ne.s32.totalorder %s256_s0, %s119_s13  ;;  %s22_s10 = int_to_ptr.vmem [resolvable:$true] %s21_s10 }
   0x4   :  { %p123_p1 = scmp.lt.u32.totalorder %s119_s13, %s256_s0 }
   0x6   :  { %p125_p2 = pnand %p123_p1, %p120_p0 }
   0x8   :  { %128 = shalt.err (!%p125_p2)
}
   0x9   :  { %s129_s18 = scalar_lea.vmem %s22_s10, 256  ;;  %p134_p4 = scmp.lt.s32.totalorder %s22_s10, %s22_s10 }
   0xa   :  { %p130_p3 = scmp.ne.s32.totalorder %s22_s10, %s129_s18  ;;  %p135_p5 = scmp.lt.s32.totalorder %s129_s18, %s129_s18 }
   0xc   :  { %p136_p6 = por %p135_p5, %p134_p4 }
   0xe   :  { %p137_p7 = pnand %p136_p6, %p130_p3 }
  0x10   :  { %140 = shalt.err (!%p137_p7)
}
  0x11   :  { %s192_s19 = smov 128   ;;  %s193_s20 = smov 8  }
  0x12   :  { %27 = dma.hbm_to_vmem [thread:$0]  %s256_s0, 256, %s22_s10, [#allocation3], %s192_s19, %s192_s19, %s193_s20  }
  0x13   :  { %s194_s23 = smov [#allocation5]   ;;  %s141_s27 = scalar_lea.hbm %s257_s1, 256 }
  0x14   :  { %s39_s24 = sshll.u32 %s194_s23, 4  ;;  %p142_p8 = scmp.ne.s32.totalorder %s257_s1, %s141_s27  ;;  %s40_s24 = int_to_ptr.vmem [resolvable:$true] %s39_s24 }
  0x15   :  { %p145_p9 = scmp.lt.u32.totalorder %s141_s27, %s257_s1 }
  0x17   :  { %p147_p10 = pnand %p145_p9, %p142_p8 }
  0x19   :  { %150 = shalt.err (!%p147_p10)
}
  0x1a   :  { %s151_s4 = scalar_lea.vmem %s40_s24, 256  ;;  %p156_p12 = scmp.lt.s32.totalorder %s40_s24, %s40_s24 }
  0x1b   :  { %p152_p11 = scmp.ne.s32.totalorder %s40_s24, %s151_s4  ;;  %p157_p13 = scmp.lt.s32.totalorder %s151_s4, %s151_s4 }
  0x1d   :  { %p158_p0 = por %p157_p13, %p156_p12 }
  0x1f   :  { %p159_p1 = pnand %p158_p0, %p152_p11 }
  0x21   :  { %162 = shalt.err (!%p159_p1)
}
  0x22   :  { %45 = dma.hbm_to_vmem [thread:$0]  %s257_s1, 256, %s40_s24, [#allocation6], %s192_s19, %s192_s19, %s193_s20  }
  0x23   :  { %185 = dma.done.wait [#allocation3], 256  }
  0x24   :  { %186 = vsyncadd [#allocation3], 4294967040 }
  0x25   :  { %187 = dma.done.wait [#allocation6], 256  }
  0x26   :  { %188 = vsyncadd [#allocation6], 4294967040  ;;  %v72_v0 = vld [vmem:[#allocation2] sm:$0xff]  ;;  %v73_v1 = vld [vmem:[#allocation2 + $0x8] sm:$0xff]  ;;  %s195_s6 = smov [#allocation7]  }
  0x27   :  { %v74_v2 = vld [vmem:[#allocation5] sm:$0xff]  ;;  %v75_v3 = vld [vmem:[#allocation5 + $0x8] sm:$0xff]  ;;  %v79_v5 = vmul.f32 %v72_v0, %v72_v0  ;;  %v80_v6 = vmul.f32 %v73_v1, %v73_v1  ;;  %s96_s7 = sshll.u32 %s195_s6, 4  ;;  %s97_s7 = int_to_ptr.vmem [resolvable:$true] %s96_s7 }
  0x28   :  { %v76_v4 = vmul.f32 %v74_v2, %v72_v0  ;;  %v82_v7 = vmul.f32 %v74_v2, %v74_v2  ;;  %v77_v8 = vmul.f32 %v75_v3, %v73_v1  ;;  %v83_v9 = vmul.f32 %v75_v3, %v75_v3  ;;  %s163_s1 = scalar_lea.vmem %s97_s7, 384  ;;  %p168_p3 = scmp.lt.s32.totalorder %s97_s7, %s97_s7 }
  0x29   :  { %v81_v10 = vadd.f32 %v80_v6, %v79_v5  ;;  %p164_p2 = scmp.ne.s32.totalorder %s97_s7, %s163_s1  ;;  %p169_p4 = scmp.lt.s32.totalorder %s163_s1, %s163_s1 }
  0x2a   :  { %v78_v11 = vadd.f32 %v77_v8, %v76_v4  ;;  %v84_v12 = vadd.f32 %v83_v9, %v82_v7 }
  0x2b   :  { %89 = vst [vmem:[#allocation7 + $0x8] sm:$0xff] %v81_v10  ;;  %p170_p5 = por %p169_p4, %p168_p3 }
  0x2c   :  { %88 = vst [vmem:[#allocation7] sm:$0xff] %v78_v11  ;;  %90 = vst [vmem:[#allocation7 + $0x10] sm:$0xff] %v84_v12 }
  0x2d   :  { %p171_p6 = pnand %p170_p5, %p164_p2 }
  0x2f   :  { %174 = shalt.err (!%p171_p6)
}
  0x30   :  { %s175_s10 = scalar_lea.hbm %s258_s2, 384 }
  0x31   :  { %p176_p7 = scmp.ne.s32.totalorder %s258_s2, %s175_s10  ;;  %p179_p8 = scmp.lt.u32.totalorder %s175_s10, %s258_s2 }
  0x33   :  { %p181_p9 = pnand %p179_p8, %p176_p7 }
  0x35   :  { %184 = shalt.err (!%p181_p9)
}
  0x36   :  { %102 = dma.vmem_to_hbm [thread:$0]  %s97_s7, 384, %s258_s2, [#allocation4], %s192_s19, %s192_s19, %s193_s20  }
  0x37   :  { %189 = dma.done.wait [#allocation4], 384  }
  0x38   :  { %190 = vsyncadd [#allocation4], 4294966912 }
  0x39   :  { %106 = vsyncpa [#allocation3], 1 }
  0x3a   :  { %107 = vsyncpa [#allocation6], 1 }
  0x3b   :  { %108 = vsyncpa [#allocation4], 1 }

</bundles_post_ra>
